<compile_context>
chip_gen: v6e
topology: v6e:2x2x1
jax: 0.10.0
libtpu: 0.0.40
codegen_flags: <defaults>
</compile_context>

<pallas_src>
import functools

import jax
import jax.numpy as jnp
from jax import lax
from jax.experimental import pallas as pl
from jax.experimental.pallas import tpu as pltpu


def _round_up(a: int, b: int) -> int:
    return -(-a // b) * b


def _padded_rows(rows: int, itemsize: int) -> int:
    # Sublane packing: f32 -> 8 rows/vreg, bf16 -> 16, int8 -> 32.
    return _round_up(rows, 32 // itemsize)


def _vmem_capacity_bytes() -> int:
    try:
        return int(pltpu.get_tpu_info().vmem_capacity_bytes)
    except Exception:
        return 64 * 1024 * 1024  # conservative fallback (v7x-sized)


def _default_n_split() -> int:
    # 2-way split only helps on chips with 2 TensorCores (v7x); on v5e/v6e the
    # grid is a serial loop and the split is pure overhead.
    try:
        kind = jax.devices()[0].device_kind.lower()
    except Exception:
        kind = ""
    return 2 if "v7" in kind else 1


def _soft_dice_kernel(logits_ref, targets_ref, inter_ref, tsum_ref, *,
                      hw, tile_hw, tiles_per_split, grid_ndim, need_mask):
    """Accumulate per-lane (N, T) partial sums for intersection and target-sum."""
    if grid_ndim == 2:
        split = pl.program_id(0)   # "parallel" split axis (v7x TensorCores)
        i = pl.program_id(1)       # "arbitrary" spatial reduction axis
    else:
        split = 0
        i = pl.program_id(0)

    @pl.when(i == 0)
    def _init():
        inter_ref[...] = jnp.zeros_like(inter_ref)
        tsum_ref[...] = jnp.zeros_like(tsum_ref)

    # Cast on the VMEM tile only; HBM stream stays at the narrow input dtypes.
    x = logits_ref[...].astype(jnp.float32)    # (N, C, T)
    t = targets_ref[...].astype(jnp.float32)   # (N, C, T)

    # Numerically-stable channel softmax; never materialize p = e / sum(e):
    # only the per-location intersection needs the normalization, and that is an
    # (N, T)-sized multiply by an EUP reciprocal instead of an (N, C, T) divide.
    m = jnp.max(x, axis=1, keepdims=True)      # (N, 1, T)
    e = jnp.exp(x - m)                         # (N, C, T), e <= 1
    denom = jnp.sum(e, axis=1)                 # (N, T), >= 1 on valid lanes

    inter_c = jnp.sum(e * t, axis=1) * pl.reciprocal(denom, approx=True)  # (N, T)
    tsum_c = jnp.sum(t, axis=1)                                           # (N, T)

    if need_mask:
        # Post-reduction lane mask: zeroes the ragged tail of the last real tile
        # and any clamped/duplicated tiles on the split axis. Reductions above
        # are along C within a lane, so garbage never leaks across lanes, and
        # jnp.where selects the zero branch even if the garbage branch is NaN.
        base = (split * tiles_per_split + i) * tile_hw
        pos = base + lax.broadcasted_iota(jnp.int32, inter_c.shape, 1)
        valid = pos < hw
        inter_c = jnp.where(valid, inter_c, 0.0)
        tsum_c = jnp.where(valid, tsum_c, 0.0)

    inter_ref[...] += inter_c
    tsum_ref[...] += tsum_c


@functools.partial(jax.jit, static_argnames=("n_split", "vmem_cap"))
def _soft_dice_loss_impl(logits, targets, *, n_split, vmem_cap):
    N, C, H, W = logits.shape
    HW = H * W

    x = logits.reshape(N, C, HW)                      # free view reshape
    if targets.dtype == jnp.bool_:
        targets = targets.astype(jnp.int8)            # narrow stream, NOT f32
    t = targets.reshape(N, C, HW)

    # ---- generation-aware VMEM budgeting (consistent with vmem_limit_bytes) ----
    vmem_limit = min(vmem_cap * 3 // 4, 96 * 1024 * 1024)   # ~96 MiB v5e/v6e, 48 MiB v7x
    budget = vmem_limit // 2                                 # ~48 MiB / 24 MiB

    x_is = jnp.dtype(x.dtype).itemsize
    t_is = jnp.dtype(t.dtype).itemsize
    # Bytes per lane including sublane padding of the C axis (second-minor dim).
    per_lane_in = N * (_padded_rows(C, x_is) * x_is + _padded_rows(C, t_is) * t_is)
    per_lane_out = 2 * _round_up(N, 8) * 4                   # two f32 (N, T) partials
    per_lane = 2 * per_lane_in + 2 * per_lane_out            # x2: double buffering

    cap_lanes = max(128, min((budget // per_lane) // 128 * 128, 65536))

    # ---- lane-dense tiling (tile_hw always a multiple of 128, no full-extent
    # fallback); split axis only when n_split > 1 ----
    L = -(-HW // 128)                       # number of 128-lane chunks
    chunks_per_split = -(-L // n_split)
    c_chunks = min(cap_lanes // 128, chunks_per_split)
    tile_hw = c_chunks * 128
    tiles_per_split = -(-chunks_per_split // c_chunks)

    num_real_tiles = -(-HW // tile_hw)
    num_virtual_tiles = n_split * tiles_per_split
    need_clamp = num_virtual_tiles > num_real_tiles
    need_mask = need_clamp or (HW % tile_hw != 0)

    grid_ndim = 1 if n_split == 1 else 2
    kernel = functools.partial(
        _soft_dice_kernel, hw=HW, tile_hw=tile_hw,
        tiles_per_split=tiles_per_split, grid_ndim=grid_ndim,
        need_mask=need_mask)

    if n_split == 1:
        grid = (tiles_per_split,)
        in_specs = [
            pl.BlockSpec((N, C, tile_hw), lambda i: (0, 0, i)),
            pl.BlockSpec((N, C, tile_hw), lambda i: (0, 0, i)),
        ]
        out_specs = [
            pl.BlockSpec((N, tile_hw), lambda i: (0, 0)),
            pl.BlockSpec((N, tile_hw), lambda i: (0, 0)),
        ]
        out_shape = (
            jax.ShapeDtypeStruct((N, tile_hw), jnp.float32),
            jax.ShapeDtypeStruct((N, tile_hw), jnp.float32),
        )
        dim_sem = ("arbitrary",)
    else:
        last_block = num_real_tiles - 1
        if need_clamp:
            # Clamp so duplicated split steps never issue a fully out-of-bounds
            # DMA; the in-kernel mask zeroes their contribution.
            def in_map(c, i, _t=tiles_per_split, _l=last_block):
                return (0, 0, jnp.minimum(c * _t + i, _l))
        else:
            def in_map(c, i, _t=tiles_per_split):
                return (0, 0, c * _t + i)
        grid = (n_split, tiles_per_split)
        in_specs = [
            pl.BlockSpec((N, C, tile_hw), in_map),
            pl.BlockSpec((N, C, tile_hw), in_map),
        ]
        out_specs = [
            pl.BlockSpec((None, N, tile_hw), lambda c, i: (c, 0, 0)),
            pl.BlockSpec((None, N, tile_hw), lambda c, i: (c, 0, 0)),
        ]
        out_shape = (
            jax.ShapeDtypeStruct((n_split, N, tile_hw), jnp.float32),
            jax.ShapeDtypeStruct((n_split, N, tile_hw), jnp.float32),
        )
        dim_sem = ("parallel", "arbitrary")

    inter_part, tsum_part = pl.pallas_call(
        kernel,
        out_shape=out_shape,
        grid_spec=pltpu.PrefetchScalarGridSpec(
            num_scalar_prefetch=0,
            grid=grid,
            in_specs=in_specs,
            out_specs=out_specs,
        ),
        compiler_params=pltpu.CompilerParams(
            dimension_semantics=dim_sem,
            vmem_limit_bytes=int(vmem_limit),
        ),
    )(x, t)

    # Final tiny reductions + scalar math (combines per-core / per-lane partials).
    smooth = 1.0
    inter = jnp.sum(inter_part, dtype=jnp.float32)
    tsum = jnp.sum(tsum_part, dtype=jnp.float32)
    psum = jnp.float32(N * HW)   # sum of softmax probs == number of spatial locations
    return 1.0 - (2.0 * inter + smooth) / (psum + tsum + smooth)


def soft_dice_loss(logits, targets, n_split=None):
    """logits, targets: NCHW arrays. Returns scalar f32 loss."""
    if n_split is None:
        n_split = _default_n_split()
    return _soft_dice_loss_impl(logits, targets, n_split=n_split,
                                vmem_cap=_vmem_capacity_bytes())


def _reference(logits, targets):
    p = jax.nn.softmax(logits.astype(jnp.float32), axis=1)
    iflat = p.reshape(-1)
    tflat = targets.astype(jnp.float32).reshape(-1)
    inter = jnp.sum(iflat * tflat)
    smooth = 1.0
    return 1.0 - (2.0 * inter + smooth) / (jnp.sum(iflat) + jnp.sum(tflat) + smooth)


if __name__ == "__main__":
    key = jax.random.PRNGKey(0)
    k1, k2 = jax.random.split(key)
    N, C, H, W = 2, 4, 16, 16
    logits = jax.random.normal(k1, (N, C, H, W), dtype=jnp.float32)
    # Binary mask targets kept at a narrow dtype (wrapper streams them as int8).
    targets = jax.random.bernoulli(k2, 0.3, (N, C, H, W))

    loss = soft_dice_loss(logits, targets)
    loss = jax.block_until_ready(loss)

    ref = _reference(logits, targets)
    # Tolerance accounts for the EUP approx-reciprocal on the softmax denominator.
    assert jnp.allclose(loss, ref, atol=5e-4, rtol=5e-4), (loss, ref)
    print("KERNEL_OK")
</pallas_src>

<mosaic_0001>
module attributes {stable_mosaic.version = 11 : i64} {
  func.func @_soft_dice_kernel(%arg0: i32, %arg1: memref<2x4x256xf32, #tpu.memory_space<vmem>>, %arg2: memref<2x4x256xi8, #tpu.memory_space<vmem>>, %arg3: memref<2x256xf32, #tpu.memory_space<vmem>>, %arg4: memref<2x256xf32, #tpu.memory_space<vmem>>) attributes {dimension_semantics = [#tpu.dimension_semantics<arbitrary>], iteration_bounds = array<i64: 1>, scalar_prefetch = 0 : i64, scratch_operands = 0 : i64, tpu.core_type = #tpu.core_type<tc>, window_params = [{transform_indices = @transform_0, window_bounds = array<i64: 2, 4, 256>}, {transform_indices = @transform_1, window_bounds = array<i64: 2, 4, 256>}, {pipeline_mode = #tpu.pipeline_mode<synchronous>, transform_indices = @transform_2, window_bounds = array<i64: 2, 256>}, {pipeline_mode = #tpu.pipeline_mode<synchronous>, transform_indices = @transform_3, window_bounds = array<i64: 2, 256>}]} {
    %c0_i32 = arith.constant 0 : i32
    %0 = arith.cmpi eq, %arg0, %c0_i32 : i32
    %1 = arith.extui %0 : i1 to i32
    %c0_i32_0 = arith.constant 0 : i32
    %2 = arith.cmpi ne, %1, %c0_i32_0 : i32
    scf.if %2 {
      %cst_17 = arith.constant 0.000000e+00 : f32
      %23 = vector.broadcast %cst_17 : f32 to vector<2x256xf32>
      %c0_18 = arith.constant 0 : index
      %c0_19 = arith.constant 0 : index
      %24 = vector.load %arg3[%c0_18, %c0_19] : memref<2x256xf32, #tpu.memory_space<vmem>>, vector<2x256xf32>
      tpu.vector_store %arg3[%c0_18, %c0_19], %23 {strides = array<i32>} : memref<2x256xf32, #tpu.memory_space<vmem>>, vector<2x256xf32>,
      %cst_20 = arith.constant 0.000000e+00 : f32
      %25 = vector.broadcast %cst_20 : f32 to vector<2x256xf32>
      %c0_21 = arith.constant 0 : index
      %c0_22 = arith.constant 0 : index
      %26 = vector.load %arg4[%c0_21, %c0_22] : memref<2x256xf32, #tpu.memory_space<vmem>>, vector<2x256xf32>
      tpu.vector_store %arg4[%c0_21, %c0_22], %25 {strides = array<i32>} : memref<2x256xf32, #tpu.memory_space<vmem>>, vector<2x256xf32>,
    } else {
    }
    %c0 = arith.constant 0 : index
    %c0_1 = arith.constant 0 : index
    %c0_2 = arith.constant 0 : index
    %3 = vector.load %arg1[%c0, %c0_1, %c0_2] : memref<2x4x256xf32, #tpu.memory_space<vmem>>, vector<2x4x256xf32>
    %c0_3 = arith.constant 0 : index
    %c0_4 = arith.constant 0 : index
    %c0_5 = arith.constant 0 : index
    %4 = vector.load %arg2[%c0_3, %c0_4, %c0_5] : memref<2x4x256xi8, #tpu.memory_space<vmem>>, vector<2x4x256xi8>
    %5 = arith.sitofp %4 : vector<2x4x256xi8> to vector<2x4x256xf32>
    %cst = arith.constant dense<0xFF800000> : vector<2x256xf32>
    %6 = vector.multi_reduction <maximumf>, %3, %cst [1] : vector<2x4x256xf32> to vector<2x256xf32>
    %7 = vector.shape_cast %6 : vector<2x256xf32> to vector<2x1x256xf32>
    %8 = vector.broadcast %7 : vector<2x1x256xf32> to vector<2x4x256xf32>
    %9 = arith.subf %3, %8 : vector<2x4x256xf32>
    %10 = math.exp %9 : vector<2x4x256xf32>
    %cst_6 = arith.constant dense<0.000000e+00> : vector<2x256xf32>
    %11 = vector.multi_reduction <add>, %10, %cst_6 [1] : vector<2x4x256xf32> to vector<2x256xf32>
    %12 = arith.mulf %10, %5 : vector<2x4x256xf32>
    %cst_7 = arith.constant dense<0.000000e+00> : vector<2x256xf32>
    %13 = vector.multi_reduction <add>, %12, %cst_7 [1] : vector<2x4x256xf32> to vector<2x256xf32>
    %14 = tpu.reciprocal %11 {approx = true} : vector<2x256xf32> -> vector<2x256xf32>
    %15 = arith.mulf %13, %14 : vector<2x256xf32>
    %cst_8 = arith.constant dense<0.000000e+00> : vector<2x256xf32>
    %16 = vector.multi_reduction <add>, %5, %cst_8 [1] : vector<2x4x256xf32> to vector<2x256xf32>
    %c0_9 = arith.constant 0 : index
    %c0_10 = arith.constant 0 : index
    %17 = vector.load %arg3[%c0_9, %c0_10] : memref<2x256xf32, #tpu.memory_space<vmem>>, vector<2x256xf32>
    %18 = arith.addf %17, %15 : vector<2x256xf32>
    %c0_11 = arith.constant 0 : index
    %c0_12 = arith.constant 0 : index
    %19 = vector.load %arg3[%c0_11, %c0_12] : memref<2x256xf32, #tpu.memory_space<vmem>>, vector<2x256xf32>
    tpu.vector_store %arg3[%c0_11, %c0_12], %18 {strides = array<i32>} : memref<2x256xf32, #tpu.memory_space<vmem>>, vector<2x256xf32>,
    %c0_13 = arith.constant 0 : index
    %c0_14 = arith.constant 0 : index
    %20 = vector.load %arg4[%c0_13, %c0_14] : memref<2x256xf32, #tpu.memory_space<vmem>>, vector<2x256xf32>
    %21 = arith.addf %20, %16 : vector<2x256xf32>
    %c0_15 = arith.constant 0 : index
    %c0_16 = arith.constant 0 : index
    %22 = vector.load %arg4[%c0_15, %c0_16] : memref<2x256xf32, #tpu.memory_space<vmem>>, vector<2x256xf32>
    tpu.vector_store %arg4[%c0_15, %c0_16], %21 {strides = array<i32>} : memref<2x256xf32, #tpu.memory_space<vmem>>, vector<2x256xf32>,
    return
  }
  func.func @transform_0(%arg0: i32) -> (i32, i32, i32) {
    %c0_i32 = arith.constant 0 : i32
    %c0_i32_0 = arith.constant 0 : i32
    %c0_i32_1 = arith.constant 0 : i32
    return %c0_i32, %c0_i32_0, %arg0 : i32, i32, i32
  }
  func.func @transform_1(%arg0: i32) -> (i32, i32, i32) {
    %c0_i32 = arith.constant 0 : i32
    %c0_i32_0 = arith.constant 0 : i32
    %c0_i32_1 = arith.constant 0 : i32
    return %c0_i32, %c0_i32_0, %arg0 : i32, i32, i32
  }
  func.func @transform_2(%arg0: i32) -> (i32, i32) {
    %c0_i32 = arith.constant 0 : i32
    %c0_i32_0 = arith.constant 0 : i32
    %c0_i32_1 = arith.constant 0 : i32
    return %c0_i32, %c0_i32_0 : i32, i32
  }
  func.func @transform_3(%arg0: i32) -> (i32, i32) {
    %c0_i32 = arith.constant 0 : i32
    %c0_i32_0 = arith.constant 0 : i32
    %c0_i32_1 = arith.constant 0 : i32
    return %c0_i32, %c0_i32_0 : i32, i32
  }
}

</mosaic_0001>

<bundles_post_ra>
// kernel: _soft_dice_loss_impl.1
= control target key start
LH: loop header
LB: loop body
LE: loop exit
PB: predicated region body
PF: predicated region fallthrough
CT: control target
= control target key end

     0   :  { %vm33_vm0 = vcmask 1043456   ;;  %v284_v0 = vmov 0.0   ;;  %v285_v19 = vmov 1983009808   ;;  %v197_v21 = vlaneseq  ;;  %s387_s2 = inlined_call_operand.vmem [shape: f32[2,256], index: 2, kind: output, shape index: {0}]   ;;  %s388_s3 = inlined_call_operand.vmem [shape: f32[2,256], index: 3, kind: output, shape index: {1}]   ;;  %s389_s0 = inlined_call_operand.vmem [shape: f32[2,4,256], index: 0, kind: input, shape index: {}]   ;;  %s390_s1 = inlined_call_operand.vmem [shape: s8[2,4,256], index: 1, kind: input, shape index: {}]  }
   0x1   :  { %17 = vst [vmem:[%s387_s2] sm:$0xf] %v284_v0  ;;  %18 = vst [vmem:[%s388_s3] sm:$0xf] %v284_v0  ;;  %v315_v1 = vld [vmem:[%s389_s0] sm:$0xff]  ;;  %v320_v2 = vld [vmem:[%s389_s0 + $0x8] sm:$0xff]  ;;  %v195_v20 = vunpack.c.l.s4 %v285_v19  ;;  %vm214_vm1 = vcmask 1041409   ;;  %vm216_vm2 = vcmask 1043459  }
   0x2   :  { %v265_v3 = vld [vmem:[%s390_s1] sm:$0xf]   ;;  %v29_v6 = vcombine.high %v315_v1, %v315_v1  ;;  %v30_v7 = vcombine.high %v320_v2, %v320_v2  ;;  %v34_v8 = vsel %vm33_vm0, %v315_v1, -inf  ;;  %v48_v9 = vsel %vm33_vm0, %v320_v2, -inf }
   0x3   :  { %v266_v4 = vunpack.c.0.s8 %v265_v3  ;;  %v267_v5 = vunpack.c.1.s8 %v265_v3  ;;  %v35_v11 = vrot.slane %v34_v8, 4  ;;  %v49_v15 = vrot.slane %v48_v9, 4 }
   0x4   :  { %v41_v12 = vsel %vm33_vm0, %v29_v6, -inf  ;;  %v55_v16 = vsel %vm33_vm0, %v30_v7, -inf  ;;  %v196_v3 = vunpack.c.0.s8 %v195_v20  ;;  %v198_v7 = vshrl.u32 %v197_v21, 7 }
   0x5   :  { %v333_v10 = vcvt.s32.f32 %v266_v4  ;;  %v336_v13 = vcvt.s32.f32 %v267_v5  ;;  %v42_v14 = vrot.slane %v41_v12, 4  ;;  %v36_v17 = vmax.f32 %v34_v8, %v35_v11 }
   0x6   :  { %v56_v18 = vrot.slane %v55_v16, 4  ;;  %v50_v23 = vmax.f32 %v48_v9, %v49_v15  ;;  %vm218_vm3 = vcmask 1045509   ;;  %vm220_vm4 = vcmask 1047559  }
   0x7   :  { %v43_v22 = vmax.f32 %v41_v12, %v42_v14  ;;  %v156_v24 = vcombine.high %v333_v10, %v333_v10  ;;  %v157_v25 = vcombine.high %v336_v13, %v336_v13  ;;  %v37_v26 = vrot.slane %v36_v17, 2 }
   0x8   :  { %v57_v27 = vmax.f32 %v55_v16, %v56_v18  ;;  %v160_v28 = vsel %vm33_vm0, %v333_v10, 0.0  ;;  %v174_v29 = vsel %vm33_vm0, %v336_v13, 0.0  ;;  %v51_v31 = vrot.slane %v50_v23, 2 }
   0x9   :  { %v44_v30 = vrot.slane %v43_v22, 2  ;;  %v161_v32 = vrot.slane %v160_v28, 4  ;;  %v167_v33 = vsel %vm33_vm0, %v156_v24, 0.0  ;;  %v38_v34 = vmax.f32 %v36_v17, %v37_v26  ;;  %v225_v24 = vld [vmem:[%s388_s3] sm:$0xf] }
   0xa   :  { %v58_v35 = vrot.slane %v57_v27, 2  ;;  %v168_v36 = vrot.slane %v167_v33, 4  ;;  %v175_v37 = vrot.slane %v174_v29, 4  ;;  %v52_v39 = vmax.f32 %v50_v23, %v51_v31 }
   0xb   :  { %v45_v38 = vmax.f32 %v43_v22, %v44_v30  ;;  %v162_v40 = vadd.f32 %v161_v32, %v160_v28  ;;  %v181_v41 = vsel %vm33_vm0, %v157_v25, 0.0  ;;  %v39_v42 = vrot.slane %v38_v34, 1 }
   0xc   :  { %v59_v43 = vmax.f32 %v57_v27, %v58_v35  ;;  %v169_v44 = vadd.f32 %v168_v36, %v167_v33  ;;  %v176_v45 = vadd.f32 %v175_v37, %v174_v29  ;;  %v53_v47 = vrot.slane %v52_v39, 1 }
   0xd   :  { %v46_v46 = vrot.slane %v45_v38, 1  ;;  %v163_v48 = vrot.slane %v162_v40, 2  ;;  %v182_v49 = vrot.slane %v181_v41, 4  ;;  %v40_v50 = vmax.f32 %v38_v34, %v39_v42 }
   0xe   :  { %v60_v51 = vrot.slane %v59_v43, 1  ;;  %v170_v52 = vrot.slane %v169_v44, 2  ;;  %v177_v53 = vrot.slane %v176_v45, 2  ;;  %v54_v55 = vmax.f32 %v52_v39, %v53_v47 }
   0xf   :  { %v47_v54 = vmax.f32 %v45_v38, %v46_v46  ;;  %v164_v56 = vadd.f32 %v163_v48, %v162_v40  ;;  %v183_v57 = vadd.f32 %v182_v49, %v181_v41  ;;  %v351_v18 = vsub.s32 %v196_v3, %v198_v7 }
  0x10   :  { %v61_v58 = vmax.f32 %v59_v43, %v60_v51  ;;  %v171_v59 = vadd.f32 %v170_v52, %v169_v44  ;;  %v178_v60 = vadd.f32 %v177_v53, %v176_v45 }
  0x11   :  { %v66_v61 = vcombine.low %v40_v50, %v47_v54  ;;  %v165_v62 = vrot.slane %v164_v56, 1  ;;  %v184_v63 = vrot.slane %v183_v57, 2 }
  0x12   :  { %v67_v0 = vcombine.low %v54_v55, %v61_v58  ;;  %v172_v4 = vrot.slane %v171_v59, 1  ;;  %v179_v5 = vrot.slane %v178_v60, 1 }
  0x13   :  { %v70_v6 = vsub.f32 %v315_v1, %v66_v61  ;;  %v166_v8 = vadd.f32 %v165_v62, %v164_v56  ;;  %v185_v9 = vadd.f32 %v184_v63, %v183_v57 }
  0x14   :  { %v71_v11 = vsub.f32 %v320_v2, %v67_v0  ;;  %v173_v12 = vadd.f32 %v172_v4, %v171_v59  ;;  %v180_v15 = vadd.f32 %v179_v5, %v178_v60 }
  0x15   :  { %v72_v14 = vmul.f32 1.442695, %v70_v6  ;;  %v186_v16 = vrot.slane %v185_v9, 1 }
  0x16   :  { %v74_v17 = vmul.f32 1.442695, %v71_v11  ;;  %v230_v22 = vcombine.low %v166_v8, %v173_v12 }
  0x17   :  { %272 = vpow2.f32 %v72_v14  ;;  %v187_v19 = vadd.f32 %v186_v16, %v185_v9 }
  0x18   :  { %274 = vpow2.f32 %v74_v17  ;;  %v237_v23 = vrot.slane %v230_v22, %v351_v18 }
  0x19   :  { %v238_v20 = vcombine.low %v180_v15, %v187_v19 }
  0x1b   :  { %v245_v1 = vrot.slane %v238_v20, %v351_v18 }
  0x1d   :  { %v248_v21 = vrot.slane %v245_v1, 7 }
  0x1f   :  { %v249_v2 = vsel %vm214_vm1, %v248_v21, %v237_v23 }
  0x20   :  { %v250_v25 = vsel %vm216_vm2, %v248_v21, %v249_v2 }
  0x21   :  { %v251_v26 = vsel %vm218_vm3, %v248_v21, %v250_v25 }
  0x22   :  { %v252_v27 = vsel %vm220_vm4, %v248_v21, %v251_v26 }
  0x23   :  { %v254_v28 = vadd.f32 %v252_v27, %v225_v24 }
  0x24   :  { %v273_v29 = vpop.eup %272 }
  0x25   :  { %v275_v30 = vpop.eup %274  ;;  %v78_v31 = vcombine.high %v273_v29, %v273_v29  ;;  %v82_v32 = vsel %vm33_vm0, %v273_v29, 0.0  ;;  %v110_v33 = vmul.f32 %v273_v29, %v333_v10  ;;  %255 = vst [vmem:[%s388_s3] sm:$0xf] %v254_v28 }
  0x26   :  { %v79_v34 = vcombine.high %v275_v30, %v275_v30  ;;  %v83_v35 = vrot.slane %v82_v32, 4  ;;  %v96_v36 = vsel %vm33_vm0, %v275_v30, 0.0  ;;  %v111_v37 = vmul.f32 %v275_v30, %v336_v13 }
  0x27   :  { %v89_v38 = vsel %vm33_vm0, %v78_v31, 0.0  ;;  %v97_v39 = vrot.slane %v96_v36, 4  ;;  %v114_v40 = vcombine.high %v110_v33, %v110_v33  ;;  %v118_v41 = vsel %vm33_vm0, %v110_v33, 0.0 }
  0x28   :  { %v84_v42 = vadd.f32 %v83_v35, %v82_v32  ;;  %v90_v43 = vrot.slane %v89_v38, 4  ;;  %v103_v10 = vsel %vm33_vm0, %v79_v34, 0.0  ;;  %v115_v44 = vcombine.high %v111_v37, %v111_v37 }
  0x29   :  { %v98_v45 = vadd.f32 %v97_v39, %v96_v36  ;;  %v104_v46 = vrot.slane %v103_v10, 4  ;;  %v119_v47 = vrot.slane %v118_v41, 4  ;;  %v125_v48 = vsel %vm33_vm0, %v114_v40, 0.0 }
  0x2a   :  { %v85_v49 = vrot.slane %v84_v42, 2  ;;  %v91_v50 = vadd.f32 %v90_v43, %v89_v38  ;;  %v126_v51 = vrot.slane %v125_v48, 4  ;;  %v132_v13 = vsel %vm33_vm0, %v111_v37, 0.0 }
  0x2b   :  { %v99_v52 = vrot.slane %v98_v45, 2  ;;  %v105_v53 = vadd.f32 %v104_v46, %v103_v10  ;;  %v133_v54 = vrot.slane %v132_v13, 4  ;;  %v120_v57 = vadd.f32 %v119_v47, %v118_v41  ;;  %v188_v10 = vld [vmem:[%s387_s2] sm:$0xf] }
  0x2c   :  { %v86_v55 = vadd.f32 %v85_v49, %v84_v42  ;;  %v92_v56 = vrot.slane %v91_v50, 2  ;;  %v139_v58 = vsel %vm33_vm0, %v115_v44, 0.0  ;;  %v127_v0 = vadd.f32 %v126_v51, %v125_v48 }
  0x2d   :  { %v100_v59 = vadd.f32 %v99_v52, %v98_v45  ;;  %v106_v60 = vrot.slane %v105_v53, 2  ;;  %v134_v61 = vadd.f32 %v133_v54, %v132_v13  ;;  %v140_v3 = vrot.slane %v139_v58, 4 }
  0x2e   :  { %v87_v62 = vrot.slane %v86_v55, 1  ;;  %v93_v63 = vadd.f32 %v92_v56, %v91_v50  ;;  %v121_v8 = vrot.slane %v120_v57, 2  ;;  %v128_v16 = vrot.slane %v127_v0, 2 }
  0x2f   :  { %v101_v4 = vrot.slane %v100_v59, 1  ;;  %v107_v5 = vadd.f32 %v106_v60, %v105_v53  ;;  %v141_v9 = vadd.f32 %v140_v3, %v139_v58  ;;  %v135_v14 = vrot.slane %v134_v61, 2 }
  0x30   :  { %v88_v6 = vadd.f32 %v87_v62, %v86_v55  ;;  %v94_v7 = vrot.slane %v93_v63, 1  ;;  %v122_v22 = vadd.f32 %v121_v8, %v120_v57  ;;  %v129_v23 = vadd.f32 %v128_v16, %v127_v0 }
  0x31   :  { %v102_v11 = vadd.f32 %v101_v4, %v100_v59  ;;  %v108_v12 = vrot.slane %v107_v5, 1  ;;  %v142_v19 = vrot.slane %v141_v9, 2  ;;  %v136_v20 = vadd.f32 %v135_v14, %v134_v61 }
  0x32   :  { %v95_v15 = vadd.f32 %v94_v7, %v93_v63  ;;  %276 = vrcp.f32 %v88_v6  ;;  %v123_v21 = vrot.slane %v122_v22, 1  ;;  %v130_v24 = vrot.slane %v129_v23, 1 }
  0x33   :  { %v109_v17 = vadd.f32 %v108_v12, %v107_v5  ;;  %278 = vrcp.f32 %v102_v11  ;;  %v143_v1 = vadd.f32 %v142_v19, %v141_v9  ;;  %v137_v2 = vrot.slane %v136_v20, 1 }
  0x34   :  { %280 = vrcp.f32 %v95_v15  ;;  %v124_v26 = vadd.f32 %v123_v21, %v122_v22  ;;  %v131_v28 = vadd.f32 %v130_v24, %v129_v23 }
  0x35   :  { %282 = vrcp.f32 %v109_v17  ;;  %v144_v25 = vrot.slane %v143_v1, 1  ;;  %v138_v27 = vadd.f32 %v137_v2, %v136_v20 }
  0x37   :  { %v145_v30 = vadd.f32 %v144_v25, %v143_v1 }
  0x3f   :  { %v277_v29 = vpop.eup %276 }
  0x40   :  { %v279_v31 = vpop.eup %278  ;;  %v150_v32 = vmul.f32 %v277_v29, %v124_v26 }
  0x41   :  { %v281_v33 = vpop.eup %280  ;;  %v152_v34 = vmul.f32 %v279_v31, %v138_v27 }
  0x42   :  { %v283_v35 = vpop.eup %282  ;;  %v151_v36 = vmul.f32 %v281_v33, %v131_v28 }
  0x43   :  { %v153_v37 = vmul.f32 %v283_v35, %v145_v30 }
  0x44   :  { %v193_v38 = vcombine.low %v150_v32, %v151_v36 }
  0x45   :  { %v201_v39 = vcombine.low %v152_v34, %v153_v37 }
  0x46   :  { %v200_v40 = vrot.slane %v193_v38, %v351_v18 }
  0x47   :  { %v208_v41 = vrot.slane %v201_v39, %v351_v18 }
  0x49   :  { %v213_v42 = vrot.slane %v208_v41, 7 }
  0x4b   :  { %v215_v43 = vsel %vm214_vm1, %v213_v42, %v200_v40 }
  0x4c   :  { %v217_v44 = vsel %vm216_vm2, %v213_v42, %v215_v43 }
  0x4d   :  { %v219_v45 = vsel %vm218_vm3, %v213_v42, %v217_v44 }
  0x4e   :  { %v221_v46 = vsel %vm220_vm4, %v213_v42, %v219_v45 }
  0x4f   :  { %v223_v47 = vadd.f32 %v221_v46, %v188_v10 }
  0x51   :  { %224 = vst [vmem:[%s387_s2] sm:$0xf] %v223_v47 }

</bundles_post_ra>
